<compile_context>
chip_gen: v5e
topology: v5e:2x2
jax: 0.10.0
libtpu: 0.0.40
codegen_flags: <defaults>
</compile_context>

<pallas_src>
import math
from functools import partial

import jax
import jax.numpy as jnp
from jax.experimental import pallas as pl
from jax.experimental.pallas import tpu as pltpu


_TILE_CANDS = (1024, 512, 256, 128)
_VMEM_BUDGET = 40 << 20        # selection budget (leaves headroom everywhere)
_VMEM_LIMIT_CAP = 48 << 20     # never request more scoped VMEM than this


def _round_up(x, m):
    return (x + m - 1) // m * m


def _vmem_limit(need_bytes):
    return int(min(max(need_bytes + (8 << 20), 16 << 20), _VMEM_LIMIT_CAP))


def _divisor_tiles(n_p):
    return [c for c in _TILE_CANDS if n_p % c == 0]


def _choose_stage1_tile(n_p, f_in, fo_p, c_size):
    """Row tile for support = x @ W (weight held resident)."""
    cands = _divisor_tiles(n_p)
    for c in cands:
        need = 2 * (c * f_in * 4 + f_in * fo_p * 4 + c * fo_p * c_size)
        if need <= _VMEM_BUDGET:
            return c, need
    c = cands[-1]
    return c, 2 * (c * f_in * 4 + f_in * fo_p * 4 + c * fo_p * c_size)


def _choose_stage2_config(n_p, fo_p, c_size):
    """Return (tm, tk, support_resident, vmem_bytes) for out = adj @ support."""
    cands = _divisor_tiles(n_p)
    # Row-tile preference: >= 2 row tiles so the "parallel" axis shards across
    # v7x's two TensorCores, ideally an even count, then the largest tile.
    multi = [c for c in cands if n_p // c >= 2]
    even = [c for c in multi if (n_p // c) % 2 == 0]
    tm_pref = even or multi or cands

    def base_bytes(tm, tk):
        return (2 * tm * tk * c_size       # adj tile (double-buffered)
                + 2 * tm * fo_p * 4        # f32 output block (accumulator)
                + 2 * fo_p * 4)            # bias row

    resident = 2 * n_p * fo_p * c_size     # whole support slab (2x buffering)
    # Pass 1: keep the support slab VMEM-resident (DMA'd once, no re-fetch).
    for tm in tm_pref:
        for tk in cands:
            need = base_bytes(tm, tk) + resident
            if need <= _VMEM_BUDGET:
                return tm, tk, True, need
    # Pass 2: per-k support tiles (re-fetched once per row tile).
    for tm in tm_pref:
        for tk in cands:
            need = base_bytes(tm, tk) + 2 * tk * fo_p * c_size
            if need <= _VMEM_BUDGET:
                return tm, tk, False, need
    tm = tk = cands[-1]
    return tm, tk, False, base_bytes(tm, tk) + 2 * tk * fo_p * c_size


# ---------------------------------------------------------------------------
# Stage 1: support = x @ W
# ---------------------------------------------------------------------------
def _support_kernel(x_ref, w_ref, s_ref):
    s_ref[...] = jnp.dot(
        x_ref[...], w_ref[...], preferred_element_type=jnp.float32
    ).astype(s_ref.dtype)


# ---------------------------------------------------------------------------
# Stage 2: out = adj @ support (+ bias), accumulated directly in o_ref (f32)
# ---------------------------------------------------------------------------
def _make_aggregate_kernel(tk, support_resident, has_bias):
    def kernel(adj_ref, s_ref, *rest):
        if has_bias:
            b_ref, o_ref = rest
        else:
            b_ref, (o_ref,) = None, rest

        k = pl.program_id(1)

        @pl.when(k == 0)
        def _():
            o_ref[...] = jnp.zeros_like(o_ref)

        if support_resident:
            start = pl.multiple_of(k * tk, tk)
            s_tile = s_ref[pl.ds(start, tk), :]
        else:
            s_tile = s_ref[...]

        # (bf16 x bf16 -> f32) accumulated into the k-resident f32 output.
        o_ref[...] += jnp.dot(adj_ref[...], s_tile,
                              preferred_element_type=jnp.float32)

        if has_bias:
            @pl.when(k == pl.num_programs(1) - 1)
            def _():
                o_ref[...] += b_ref[...].astype(o_ref.dtype)

    return kernel


@partial(jax.jit, static_argnames=("compute_dtype",))
def graph_convolution(x, adj, weight, bias=None, *, compute_dtype=jnp.bfloat16):
    """Pallas implementation of GraphConvolution.forward.

    x:      (N, F_in)     float32
    adj:    (N, N)        float32 (or already `compute_dtype` -> no cast pass)
    weight: (F_in, F_out) float32
    bias:   (F_out,)      float32 or None
    compute_dtype: MXU input dtype for both matmuls (accumulation is always
      f32).  bf16 halves HBM traffic of the dominant adj stream; pass
      jnp.float32 for exact f32 math.
    returns (N, F_out)    float32
    """
    N, F_in = x.shape
    F_out = weight.shape[1]
    c_size = jnp.dtype(compute_dtype).itemsize

    N_p = _round_up(N, 128)
    Fo_p = _round_up(F_out, 128)
    has_bias = bias is not None

    # ---- Cheap (feature-dim / row) padding --------------------------------
    x_p = x if N_p == N else jnp.pad(x, ((0, N_p - N), (0, 0)))
    w_p = weight if Fo_p == F_out else jnp.pad(weight,
                                               ((0, 0), (0, Fo_p - F_out)))
    if has_bias:
        b_p = bias.reshape(1, F_out).astype(jnp.float32)
        if Fo_p != F_out:
            b_p = jnp.pad(b_p, ((0, 0), (0, Fo_p - F_out)))

    # ---- adj: cast to compute dtype; pad only if N is ragged --------------
    # Callers that reuse adj (training loops) should pass it pre-cast to
    # `compute_dtype`; the astype below is then a no-op.
    adj_c = adj if adj.dtype == compute_dtype else adj.astype(compute_dtype)
    if N_p != N:
        # TODO(synk): for ragged N, mask the last i/k tile in-kernel
        # (broadcasted_iota vs a scalar-prefetched N) instead of materializing
        # a padded copy of the N^2 adjacency.
        adj_c = jnp.pad(adj_c, ((0, N_p - N), (0, N_p - N)))

    # ---- Stage 1: support = x @ W (produced in compute_dtype) -------------
    tm1, need1 = _choose_stage1_tile(N_p, F_in, Fo_p, c_size)
    support = pl.pallas_call(
        _support_kernel,
        out_shape=jax.ShapeDtypeStruct((N_p, Fo_p), compute_dtype),
        grid_spec=pltpu.PrefetchScalarGridSpec(
            num_scalar_prefetch=0,
            grid=(N_p // tm1,),
            in_specs=[
                pl.BlockSpec((tm1, F_in), lambda i: (i, 0)),
                pl.BlockSpec((F_in, Fo_p), lambda i: (0, 0)),
            ],
            out_specs=pl.BlockSpec((tm1, Fo_p), lambda i: (i, 0)),
        ),
        compiler_params=pltpu.CompilerParams(
            dimension_semantics=("parallel",),
            vmem_limit_bytes=_vmem_limit(need1)),
        cost_estimate=pl.CostEstimate(
            flops=2 * N_p * F_in * Fo_p,
            transcendentals=0,
            bytes_accessed=4 * N_p * F_in + 4 * F_in * Fo_p
                           + c_size * N_p * Fo_p),
    )(x_p, w_p)

    # ---- Stage 2: out = adj @ support (+ bias) -----------------------------
    tm, tk, support_resident, need2 = _choose_stage2_config(N_p, Fo_p, c_size)

    in_specs = [pl.BlockSpec((tm, tk), lambda i, k: (i, k))]        # adj tile
    if support_resident:
        in_specs.append(pl.BlockSpec((N_p, Fo_p), lambda i, k: (0, 0)))
    else:
        in_specs.append(pl.BlockSpec((tk, Fo_p), lambda i, k: (k, 0)))
    operands = [adj_c, support]
    if has_bias:
        in_specs.append(pl.BlockSpec((1, Fo_p), lambda i, k: (0, 0)))
        operands.append(b_p)

    sup_fetches = 1 if support_resident else (N_p // tm)
    out_p = pl.pallas_call(
        _make_aggregate_kernel(tk, support_resident, has_bias),
        out_shape=jax.ShapeDtypeStruct((N_p, Fo_p), jnp.float32),
        grid_spec=pltpu.PrefetchScalarGridSpec(
            num_scalar_prefetch=0,
            grid=(N_p // tm, N_p // tk),
            in_specs=in_specs,
            out_specs=pl.BlockSpec((tm, Fo_p), lambda i, k: (i, 0)),
        ),
        compiler_params=pltpu.CompilerParams(
            dimension_semantics=("parallel", "arbitrary"),
            vmem_limit_bytes=_vmem_limit(need2)),
        cost_estimate=pl.CostEstimate(
            flops=2 * N_p * N_p * Fo_p,
            transcendentals=0,
            bytes_accessed=c_size * N_p * N_p
                           + c_size * sup_fetches * N_p * Fo_p
                           + 4 * N_p * Fo_p + 4 * Fo_p),
    )(*operands)

    if N_p != N or Fo_p != F_out:
        out_p = out_p[:N, :F_out]
    return out_p


def init_gcn_params(key, in_features, out_features, bias=True):
    """Deterministic re-implementation of GraphConvolution.reset_parameters."""
    stdv = 1.0 / math.sqrt(out_features)
    k_w, k_b = jax.random.split(key)
    weight = jax.random.uniform(
        k_w, (in_features, out_features), minval=-stdv, maxval=stdv,
        dtype=jnp.float32)
    b = None
    if bias:
        b = jax.random.uniform(
            k_b, (out_features,), minval=-stdv, maxval=stdv, dtype=jnp.float32)
    return weight, b


if __name__ == "__main__":
    key = jax.random.PRNGKey(0)
    k_x, k_adj, k_p = jax.random.split(key, 3)

    # Small GCN problem: N nodes, in/out feature dims.
    N, F_in, F_out = 128, 64, 32

    x = jax.random.normal(k_x, (N, F_in), dtype=jnp.float32)
    a = jax.random.uniform(k_adj, (N, N), dtype=jnp.float32)
    adj = (a + a.T) / (2.0 * N)   # symmetric, normalized-ish dense adjacency

    weight, bias = init_gcn_params(k_p, F_in, F_out, bias=True)

    ref = adj @ (x @ weight) + bias

    # Default path: bf16 MXU inputs, f32 accumulation.
    out = jax.block_until_ready(graph_convolution(x, adj, weight, bias))
    assert out.shape == (N, F_out)
    assert out.dtype == jnp.float32
    assert jnp.allclose(out, ref, atol=2e-2, rtol=2e-2)

    # Exact f32 path.
    out_f32 = jax.block_until_ready(
        graph_convolution(x, adj, weight, bias, compute_dtype=jnp.float32))
    assert jnp.allclose(out_f32, ref, atol=1e-4, rtol=1e-4)

    # No-bias path.
    out_nb = jax.block_until_ready(
        graph_convolution(x, adj, weight, None, compute_dtype=jnp.float32))
    assert jnp.allclose(out_nb, adj @ (x @ weight), atol=1e-4, rtol=1e-4)

    print("KERNEL_OK")
</pallas_src>

<mosaic_0001>
module attributes {stable_mosaic.version = 11 : i64} {
  func.func @_support_kernel(%arg0: i32, %arg1: memref<128x64xf32, #tpu.memory_space<vmem>>, %arg2: memref<64x128xf32, #tpu.memory_space<vmem>>, %arg3: memref<128x128xbf16, #tpu.memory_space<vmem>>) attributes {dimension_semantics = [#tpu.dimension_semantics<parallel>], iteration_bounds = array<i64: 1>, scalar_prefetch = 0 : i64, scratch_operands = 0 : i64, tpu.core_type = #tpu.core_type<tc>, window_params = [{transform_indices = @transform_0, window_bounds = array<i64: 128, 64>}, {pipeline_mode = #tpu.pipeline_mode<synchronous>, transform_indices = @transform_1, window_bounds = array<i64: 64, 128>}, {transform_indices = @transform_2, window_bounds = array<i64: 128, 128>}]} {
    %c0 = arith.constant 0 : index
    %c0_0 = arith.constant 0 : index
    %0 = vector.load %arg1[%c0, %c0_0] : memref<128x64xf32, #tpu.memory_space<vmem>>, vector<128x64xf32>
    %c0_1 = arith.constant 0 : index
    %c0_2 = arith.constant 0 : index
    %1 = vector.load %arg2[%c0_1, %c0_2] : memref<64x128xf32, #tpu.memory_space<vmem>>, vector<64x128xf32>
    %cst = arith.constant dense<0.000000e+00> : vector<128x128xf32>
    %2 = tpu.matmul %0, %1, %cst {dimension_numbers = #tpu.dot_dimension_numbers<[1], [0], [0], [1], [0, 0, 1, 1], [], []>} : vector<128x64xf32>, vector<64x128xf32>, vector<128x128xf32> -> vector<128x128xf32>
    %3 = arith.truncf %2 : vector<128x128xf32> to vector<128x128xbf16>
    %c0_3 = arith.constant 0 : index
    %c0_4 = arith.constant 0 : index
    %4 = vector.load %arg3[%c0_3, %c0_4] : memref<128x128xbf16, #tpu.memory_space<vmem>>, vector<128x128xbf16>
    tpu.vector_store %arg3[%c0_3, %c0_4], %3 {strides = array<i32>} : memref<128x128xbf16, #tpu.memory_space<vmem>>, vector<128x128xbf16>,
    return
  }
  func.func @transform_0(%arg0: i32) -> (i32, i32) {
    %c0_i32 = arith.constant 0 : i32
    %c0_i32_0 = arith.constant 0 : i32
    return %arg0, %c0_i32 : i32, i32
  }
  func.func @transform_1(%arg0: i32) -> (i32, i32) {
    %c0_i32 = arith.constant 0 : i32
    %c0_i32_0 = arith.constant 0 : i32
    %c0_i32_1 = arith.constant 0 : i32
    return %c0_i32, %c0_i32_0 : i32, i32
  }
  func.func @transform_2(%arg0: i32) -> (i32, i32) {
    %c0_i32 = arith.constant 0 : i32
    %c0_i32_0 = arith.constant 0 : i32
    return %arg0, %c0_i32 : i32, i32
  }
}

module attributes {stable_mosaic.version = 11 : i64} {
  func.func @kernel(%arg0: i32, %arg1: i32, %arg2: memref<128x128xbf16, #tpu.memory_space<vmem>>, %arg3: memref<128x128xbf16, #tpu.memory_space<vmem>>, %arg4: memref<1x128xf32, #tpu.memory_space<vmem>>, %arg5: memref<128x128xf32, #tpu.memory_space<vmem>>) attributes {dimension_semantics = [#tpu.dimension_semantics<parallel>, #tpu.dimension_semantics<arbitrary>], iteration_bounds = array<i64: 1, 1>, scalar_prefetch = 0 : i64, scratch_operands = 0 : i64, tpu.core_type = #tpu.core_type<tc>, window_params = [{transform_indices = @transform_0, window_bounds = array<i64: 128, 128>}, {pipeline_mode = #tpu.pipeline_mode<synchronous>, transform_indices = @transform_1, window_bounds = array<i64: 128, 128>}, {pipeline_mode = #tpu.pipeline_mode<synchronous>, transform_indices = @transform_2, window_bounds = array<i64: 1, 128>}, {transform_indices = @transform_3, window_bounds = array<i64: 128, 128>}]} {
    %c0_i32 = arith.constant 0 : i32
    %0 = arith.cmpi eq, %arg1, %c0_i32 : i32
    %1 = arith.extui %0 : i1 to i32
    %c0_i32_0 = arith.constant 0 : i32
    %2 = arith.cmpi ne, %1, %c0_i32_0 : i32
    scf.if %2 {
      %cst_9 = arith.constant 0.000000e+00 : f32
      %15 = vector.broadcast %cst_9 : f32 to vector<128x128xf32>
      %c0_10 = arith.constant 0 : index
      %c0_11 = arith.constant 0 : index
      %16 = vector.load %arg5[%c0_10, %c0_11] : memref<128x128xf32, #tpu.memory_space<vmem>>, vector<128x128xf32>
      tpu.vector_store %arg5[%c0_10, %c0_11], %15 {strides = array<i32>} : memref<128x128xf32, #tpu.memory_space<vmem>>, vector<128x128xf32>,
    } else {
    }
    %c128_i32 = arith.constant 128 : i32
    %3 = arith.muli %arg1, %c128_i32 : i32
    %4 = tpu.assume_multiple %3, 128 : i32
    %5 = arith.index_cast %4 : i32 to index
    %c0 = arith.constant 0 : index
    %6 = vector.load %arg3[%5, %c0] : memref<128x128xbf16, #tpu.memory_space<vmem>>, vector<128x128xbf16>
    %c0_1 = arith.constant 0 : index
    %c0_2 = arith.constant 0 : index
    %7 = vector.load %arg5[%c0_1, %c0_2] : memref<128x128xf32, #tpu.memory_space<vmem>>, vector<128x128xf32>
    %c0_3 = arith.constant 0 : index
    %c0_4 = arith.constant 0 : index
    %8 = vector.load %arg2[%c0_3, %c0_4] : memref<128x128xbf16, #tpu.memory_space<vmem>>, vector<128x128xbf16>
    %cst = arith.constant dense<0.000000e+00> : vector<128x128xf32>
    %9 = tpu.matmul %8, %6, %cst {dimension_numbers = #tpu.dot_dimension_numbers<[1], [0], [0], [1], [0, 0, 1, 1], [], []>} : vector<128x128xbf16>, vector<128x128xbf16>, vector<128x128xf32> -> vector<128x128xf32>
    %10 = arith.addf %7, %9 : vector<128x128xf32>
    %c0_5 = arith.constant 0 : index
    %c0_6 = arith.constant 0 : index
    %11 = vector.load %arg5[%c0_5, %c0_6] : memref<128x128xf32, #tpu.memory_space<vmem>>, vector<128x128xf32>
    tpu.vector_store %arg5[%c0_5, %c0_6], %10 {strides = array<i32>} : memref<128x128xf32, #tpu.memory_space<vmem>>, vector<128x128xf32>,
    %c0_i32_7 = arith.constant 0 : i32
    %12 = arith.cmpi eq, %arg1, %c0_i32_7 : i32
    %13 = arith.extui %12 : i1 to i32
    %c0_i32_8 = arith.constant 0 : i32
    %14 = arith.cmpi ne, %13, %c0_i32_8 : i32
    scf.if %14 {
      %c0_9 = arith.constant 0 : index
      %c0_10 = arith.constant 0 : index
      %15 = vector.load %arg5[%c0_9, %c0_10] : memref<128x128xf32, #tpu.memory_space<vmem>>, vector<128x128xf32>
      %c0_11 = arith.constant 0 : index
      %c0_12 = arith.constant 0 : index
      %16 = vector.load %arg4[%c0_11, %c0_12] : memref<1x128xf32, #tpu.memory_space<vmem>>, vector<1x128xf32>
      %17 = vector.broadcast %16 : vector<1x128xf32> to vector<128x128xf32>
      %18 = arith.addf %15, %17 : vector<128x128xf32>
      %c0_13 = arith.constant 0 : index
      %c0_14 = arith.constant 0 : index
      %19 = vector.load %arg5[%c0_13, %c0_14] : memref<128x128xf32, #tpu.memory_space<vmem>>, vector<128x128xf32>
      tpu.vector_store %arg5[%c0_13, %c0_14], %18 {strides = array<i32>} : memref<128x128xf32, #tpu.memory_space<vmem>>, vector<128x128xf32>,
    } else {
    }
    return
  }
  func.func @transform_0(%arg0: i32, %arg1: i32) -> (i32, i32) {
    %c0_i32 = arith.constant 0 : i32
    return %arg0, %arg1 : i32, i32
  }
  func.func @transform_1(%arg0: i32, %arg1: i32) -> (i32, i32) {
    %c0_i32 = arith.constant 0 : i32
    %c0_i32_0 = arith.constant 0 : i32
    %c0_i32_1 = arith.constant 0 : i32
    return %c0_i32, %c0_i32_0 : i32, i32
  }
  func.func @transform_2(%arg0: i32, %arg1: i32) -> (i32, i32) {
    %c0_i32 = arith.constant 0 : i32
    %c0_i32_0 = arith.constant 0 : i32
    %c0_i32_1 = arith.constant 0 : i32
    return %c0_i32, %c0_i32_0 : i32, i32
  }
  func.func @transform_3(%arg0: i32, %arg1: i32) -> (i32, i32) {
    %c0_i32 = arith.constant 0 : i32
    %c0_i32_0 = arith.constant 0 : i32
    return %arg0, %c0_i32 : i32, i32
  }
}

</mosaic_0001>

<bundles_post_ra>
// kernel: graph_convolution.2
= control target key start
LH: loop header
LB: loop body
LE: loop exit
PB: predicated region body
PF: predicated region fallthrough
CT: control target
= control target key end

     0   :  { %vm35_vm0 = vcmask 523264   ;;  %s399_s1 = inlined_call_operand.vmem [shape: f32[64,128], index: 1, kind: input, shape index: {}]   ;;  %s400_s0 = inlined_call_operand.vmem [shape: f32[128,64], index: 0, kind: input, shape index: {}]   ;;  %s401_s2 = inlined_call_operand.vmem [shape: bf16[128,128], index: 2, kind: output, shape index: {}]  }
   0x1   :  { %v34_v0 = vld [vmem:[%s399_s1 + $0x38] sm:$0xff]  ;;  %v33_v1 = vld [vmem:[%s399_s1 + $0x30] sm:$0xff]  ;;  %v32_v2 = vld [vmem:[%s399_s1 + $0x28] sm:$0xff] }
   0x2   :  { %92 = vmatpush.msra.mxu0 %v34_v0  ;;  %248 = vmatpush.msra.mxu1 %v34_v0  ;;  %v31_v3 = vld [vmem:[%s399_s1 + $0x20] sm:$0xff]  ;;  %v30_v4 = vld [vmem:[%s399_s1 + $0x18] sm:$0xff]  ;;  %v29_v5 = vld [vmem:[%s399_s1 + $0x10] sm:$0xff] }
   0x3   :  { %249 = vmatpush.msra.mxu2 %v34_v0  ;;  %250 = vmatpush.msra.mxu3 %v34_v0  ;;  %v28_v6 = vld [vmem:[%s399_s1 + $0x8] sm:$0xff]  ;;  %v27_v7 = vld [vmem:[%s399_s1] sm:$0xff]  ;;  %v13_v16 = vld [vmem:[%s400_s0 + $0x10] sm:$0xff] }
   0x4   :  { %93 = vmatpush.msra.mxu0 %v33_v1  ;;  %251 = vmatpush.msra.mxu1 %v33_v1  ;;  %v11_v8 = vld [vmem:[%s400_s0] sm:$0xff]  ;;  %v12_v12 = vld [vmem:[%s400_s0 + $0x8] sm:$0xff]  ;;  %v17_v17 = vld [vmem:[%s400_s0 + $0x30] sm:$0xff] }
   0x5   :  { %252 = vmatpush.msra.mxu2 %v33_v1  ;;  %253 = vmatpush.msra.mxu3 %v33_v1  ;;  %v15_v9 = vld [vmem:[%s400_s0 + $0x20] sm:$0xff]  ;;  %v16_v13 = vld [vmem:[%s400_s0 + $0x28] sm:$0xff]  ;;  %v21_v18 = vld [vmem:[%s400_s0 + $0x50] sm:$0xff] }
   0x6   :  { %94 = vmatpush.msra.mxu0 %v32_v2  ;;  %254 = vmatpush.msra.mxu1 %v32_v2  ;;  %v19_v10 = vld [vmem:[%s400_s0 + $0x40] sm:$0xff]  ;;  %v20_v14 = vld [vmem:[%s400_s0 + $0x48] sm:$0xff]  ;;  %v25_v19 = vld [vmem:[%s400_s0 + $0x70] sm:$0xff] }
   0x7   :  { %255 = vmatpush.msra.mxu2 %v32_v2  ;;  %256 = vmatpush.msra.mxu3 %v32_v2  ;;  %v23_v11 = vld [vmem:[%s400_s0 + $0x60] sm:$0xff]  ;;  %v24_v15 = vld [vmem:[%s400_s0 + $0x68] sm:$0xff]  ;;  %v14_v20 = vld [vmem:[%s400_s0 + $0x18] sm:$0xff] }
   0x8   :  { %95 = vmatpush.msra.mxu0 %v31_v3  ;;  %257 = vmatpush.msra.mxu1 %v31_v3  ;;  %v18_v21 = vld [vmem:[%s400_s0 + $0x38] sm:$0xff] }
   0x9   :  { %258 = vmatpush.msra.mxu2 %v31_v3  ;;  %259 = vmatpush.msra.mxu3 %v31_v3  ;;  %v22_v22 = vld [vmem:[%s400_s0 + $0x58] sm:$0xff] }
   0xa   :  { %96 = vmatpush.msra.mxu0 %v30_v4  ;;  %260 = vmatpush.msra.mxu1 %v30_v4  ;;  %v26_v23 = vld [vmem:[%s400_s0 + $0x78] sm:$0xff] }
   0xb   :  { %261 = vmatpush.msra.mxu2 %v30_v4  ;;  %262 = vmatpush.msra.mxu3 %v30_v4 }
   0xc   :  { %97 = vmatpush.msra.mxu0 %v29_v5  ;;  %263 = vmatpush.msra.mxu1 %v29_v5 }
   0xd   :  { %264 = vmatpush.msra.mxu2 %v29_v5  ;;  %265 = vmatpush.msra.mxu3 %v29_v5 }
   0xe   :  { %98 = vmatpush.msra.mxu0 %v28_v6  ;;  %266 = vmatpush.msra.mxu1 %v28_v6 }
   0xf   :  { %267 = vmatpush.msra.mxu2 %v28_v6  ;;  %268 = vmatpush.msra.mxu3 %v28_v6 }
  0x10   :  { %99 = vmatpush.msra.mxu0 %v27_v7  ;;  %269 = vmatpush.msra.mxu1 %v27_v7 }
  0x11   :  { %270 = vmatpush.msra.mxu2 %v27_v7  ;;  %271 = vmatpush.msra.mxu3 %v27_v7 }
  0x12   :  { %185 = vmatmul.msk.f32.vlgmr.msra.gmra.mxu0 %vm35_vm0, %v11_v8  ;;  %189 = vmatmul.msk.f32.vlgmr.msra.gmra.mxu1 %vm35_vm0, %v15_v9 }
  0x13   :  { %193 = vmatmul.msk.f32.vlgmr.msra.gmra.mxu2 %vm35_vm0, %v19_v10  ;;  %197 = vmatmul.msk.f32.vlgmr.msra.gmra.mxu3 %vm35_vm0, %v23_v11 }
  0x1a   :  { %186 = vmatmul.msk.f32.gmra.mxu0 %vm35_vm0, %v12_v12  ;;  %190 = vmatmul.msk.f32.gmra.mxu1 %vm35_vm0, %v16_v13 }
  0x1b   :  { %194 = vmatmul.msk.f32.gmra.mxu2 %vm35_vm0, %v20_v14  ;;  %198 = vmatmul.msk.f32.gmra.mxu3 %vm35_vm0, %v24_v15 }
  0x22   :  { %187 = vmatmul.msk.f32.gmra.mxu0 %vm35_vm0, %v13_v16  ;;  %191 = vmatmul.msk.f32.gmra.mxu1 %vm35_vm0, %v17_v17 }
  0x23   :  { %195 = vmatmul.msk.f32.gmra.mxu2 %vm35_vm0, %v21_v18  ;;  %199 = vmatmul.msk.f32.gmra.mxu3 %vm35_vm0, %v25_v19 }
  0x2a   :  { %188 = vmatmul.msk.f32.gmra.mxu0 %vm35_vm0, %v14_v20  ;;  %192 = vmatmul.msk.f32.gmra.mxu1 %vm35_vm0, %v18_v21 }
  0x2b   :  { %196 = vmatmul.msk.f32.gmra.mxu2 %vm35_vm0, %v22_v22  ;;  %200 = vmatmul.msk.f32.gmra.mxu3 %vm35_vm0, %v26_v23 }
  0x8f   :  { %v101_v24 = vpop.f32.mrf.mxu0  ;;  %v113_v25 = vpop.f32.mrf.mxu1 }
  0x96   :  { %v125_v26 = vpop.f32.mrf.mxu2  ;;  %v137_v27 = vpop.f32.mrf.mxu3 }
  0x97   :  { %v104_v28 = vpop.f32.mrf.mxu0  ;;  %v116_v29 = vpop.f32.mrf.mxu1 }
  0x98   :  { %v204_v30 = vpack.c.bf16 %v104_v28, %v101_v24  ;;  %v214_v31 = vpack.c.bf16 %v116_v29, %v113_v25 }
  0x9a   :  { %205 = vst [vmem:[%s401_s2] sm:$0xff] %v204_v30  }
  0x9b   :  { %242 = vst [vmem:[%s401_s2 + $0x10] sm:$0xff] %v214_v31  }
  0x9e   :  { %v128_v32 = vpop.f32.mrf.mxu2  ;;  %v140_v33 = vpop.f32.mrf.mxu3 }
  0x9f   :  { %v224_v34 = vpack.c.bf16 %v128_v32, %v125_v26  ;;  %v234_v35 = vpack.c.bf16 %v140_v33, %v137_v27  ;;  %v107_v36 = vpop.f32.mrf.mxu0  ;;  %v119_v37 = vpop.f32.mrf.mxu1 }
  0xa1   :  { %244 = vst [vmem:[%s401_s2 + $0x20] sm:$0xff] %v224_v34  }
  0xa2   :  { %246 = vst [vmem:[%s401_s2 + $0x30] sm:$0xff] %v234_v35  }
  0xa6   :  { %v131_v38 = vpop.f32.mrf.mxu2  ;;  %v143_v39 = vpop.f32.mrf.mxu3 }
  0xa7   :  { %v110_v40 = vpop.f32.mrf.mxu0  ;;  %v122_v41 = vpop.f32.mrf.mxu1 }
  0xa8   :  { %v209_v42 = vpack.c.bf16 %v110_v40, %v107_v36  ;;  %v219_v43 = vpack.c.bf16 %v122_v41, %v119_v37 }
  0xaa   :  { %241 = vst [vmem:[%s401_s2 + $0x8] sm:$0xff] %v209_v42  }
  0xab   :  { %243 = vst [vmem:[%s401_s2 + $0x18] sm:$0xff] %v219_v43  }
  0xae   :  { %v134_v44 = vpop.f32.mrf.mxu2  ;;  %v146_v45 = vpop.f32.mrf.mxu3 }
  0xaf   :  { %v229_v46 = vpack.c.bf16 %v134_v44, %v131_v38  ;;  %v239_v47 = vpack.c.bf16 %v146_v45, %v143_v39 }
  0xb1   :  { %245 = vst [vmem:[%s401_s2 + $0x28] sm:$0xff] %v229_v46  }
  0xb2   :  { %247 = vst [vmem:[%s401_s2 + $0x38] sm:$0xff] %v239_v47  }

// kernel: graph_convolution.3
= control target key start
LH: loop header
LB: loop body
LE: loop exit
PB: predicated region body
PF: predicated region fallthrough
CT: control target
= control target key end

     0   :  { %s550_s1 = inlined_call_operand.vmem [shape: bf16[128,128], index: 1, kind: input, shape index: {}]   ;;  %s551_s2 = inlined_call_operand.vmem [shape: f32[1,128], index: 2, kind: input, shape index: {}]   ;;  %s552_s0 = inlined_call_operand.vmem [shape: bf16[128,128], index: 0, kind: input, shape index: {}]   ;;  %s553_s3 = inlined_call_operand.vmem [shape: f32[128,128], index: 3, kind: output, shape index: {}]  }
   0x1   :  { %v396_v0 = vld [vmem:[%s550_s1 + $0x38] sm:$0xff]  ;;  %v395_v1 = vld [vmem:[%s550_s1 + $0x30] sm:$0xff]  ;;  %v394_v2 = vld [vmem:[%s550_s1 + $0x28] sm:$0xff] }
   0x2   :  { %183 = vmatpush.bf16.msra.mxu0 %v396_v0  ;;  %405 = vmatpush.bf16.msra.mxu1 %v396_v0  ;;  %v393_v3 = vld [vmem:[%s550_s1 + $0x20] sm:$0xff]  ;;  %v392_v4 = vld [vmem:[%s550_s1 + $0x18] sm:$0xff]  ;;  %v391_v5 = vld [vmem:[%s550_s1 + $0x10] sm:$0xff] }
   0x3   :  { %406 = vmatpush.bf16.msra.mxu2 %v396_v0  ;;  %407 = vmatpush.bf16.msra.mxu3 %v396_v0  ;;  %v390_v6 = vld [vmem:[%s550_s1 + $0x8] sm:$0xff]  ;;  %v389_v7 = vld [vmem:[%s550_s1] sm:$0xff]  ;;  %v399_v9 = vld [vmem:[%s552_s0 + $0x10] sm:$0xff] }
   0x4   :  { %v397_v8 = vld [vmem:[%s552_s0] sm:$0xff]  ;;  %v403_v11 = vld [vmem:[%s552_s0 + $0x30] sm:$0xff]  ;;  %v398_v12 = vld [vmem:[%s552_s0 + $0x8] sm:$0xff] }
   0x5   :  { %v401_v10 = vld [vmem:[%s552_s0 + $0x20] sm:$0xff]  ;;  %v400_v13 = vld [vmem:[%s552_s0 + $0x18] sm:$0xff]  ;;  %v402_v14 = vld [vmem:[%s552_s0 + $0x28] sm:$0xff] }
   0x6   :  { %184 = vmatpush.bf16.msra.mxu0 %v395_v1  ;;  %408 = vmatpush.bf16.msra.mxu1 %v395_v1  ;;  %v404_v15 = vld [vmem:[%s552_s0 + $0x38] sm:$0xff]  ;;  %v430_v16 = vld [vmem:[%s551_s2] ss:$0 sm:$0xff] }
   0x7   :  { %409 = vmatpush.bf16.msra.mxu2 %v395_v1  ;;  %410 = vmatpush.bf16.msra.mxu3 %v395_v1 }
   0xa   :  { %185 = vmatpush.bf16.msra.mxu0 %v394_v2  ;;  %411 = vmatpush.bf16.msra.mxu1 %v394_v2 }
   0xb   :  { %412 = vmatpush.bf16.msra.mxu2 %v394_v2  ;;  %413 = vmatpush.bf16.msra.mxu3 %v394_v2 }
   0xe   :  { %186 = vmatpush.bf16.msra.mxu0 %v393_v3  ;;  %414 = vmatpush.bf16.msra.mxu1 %v393_v3 }
   0xf   :  { %415 = vmatpush.bf16.msra.mxu2 %v393_v3  ;;  %416 = vmatpush.bf16.msra.mxu3 %v393_v3 }
  0x12   :  { %187 = vmatpush.bf16.msra.mxu0 %v392_v4  ;;  %417 = vmatpush.bf16.msra.mxu1 %v392_v4 }
  0x13   :  { %418 = vmatpush.bf16.msra.mxu2 %v392_v4  ;;  %419 = vmatpush.bf16.msra.mxu3 %v392_v4 }
  0x16   :  { %188 = vmatpush.bf16.msra.mxu0 %v391_v5  ;;  %420 = vmatpush.bf16.msra.mxu1 %v391_v5 }
  0x17   :  { %421 = vmatpush.bf16.msra.mxu2 %v391_v5  ;;  %422 = vmatpush.bf16.msra.mxu3 %v391_v5 }
  0x1a   :  { %189 = vmatpush.bf16.msra.mxu0 %v390_v6  ;;  %423 = vmatpush.bf16.msra.mxu1 %v390_v6 }
  0x1b   :  { %424 = vmatpush.bf16.msra.mxu2 %v390_v6  ;;  %425 = vmatpush.bf16.msra.mxu3 %v390_v6 }
  0x1e   :  { %190 = vmatpush.bf16.msra.mxu0 %v389_v7  ;;  %426 = vmatpush.bf16.msra.mxu1 %v389_v7 }
  0x1f   :  { %427 = vmatpush.bf16.msra.mxu2 %v389_v7  ;;  %428 = vmatpush.bf16.msra.mxu3 %v389_v7 }
  0x21   :  { %191 = vmatmul.bf16.vlgmr.msra.gmra.mxu0 %v397_v8  ;;  %201 = vmatmul.bf16.vlgmr.msra.gmra.mxu1 %v399_v9 }
  0x22   :  { %211 = vmatmul.bf16.vlgmr.msra.gmra.mxu2 %v401_v10  ;;  %221 = vmatmul.bf16.vlgmr.msra.gmra.mxu3 %v403_v11 }
  0x31   :  { %196 = vmatmul.bf16.gmra.mxu0 %v398_v12  ;;  %206 = vmatmul.bf16.gmra.mxu1 %v400_v13 }
  0x32   :  { %216 = vmatmul.bf16.gmra.mxu2 %v402_v14  ;;  %226 = vmatmul.bf16.gmra.mxu3 %v404_v15 }
  0x9e   :  { %v192_v17 = vpop.f32.mrf.mxu0  ;;  %v202_v18 = vpop.f32.mrf.mxu1 }
  0x9f   :  { %v287_v19 = vadd.f32 %v430_v16, %v192_v17  ;;  %v291_v20 = vadd.f32 %v430_v16, %v202_v18 }
  0xa1   :  { %303 = vst [vmem:[%s553_s3] sm:$0xff] %v287_v19 }
  0xa2   :  { %307 = vst [vmem:[%s553_s3 + $0x20] sm:$0xff] %v291_v20 }
  0xa5   :  { %v212_v21 = vpop.f32.mrf.mxu2  ;;  %v222_v22 = vpop.f32.mrf.mxu3 }
  0xa6   :  { %v194_v23 = vpop.f32.mrf.mxu0  ;;  %v204_v24 = vpop.f32.mrf.mxu1  ;;  %v295_v25 = vadd.f32 %v430_v16, %v212_v21  ;;  %v299_v26 = vadd.f32 %v430_v16, %v222_v22 }
  0xa7   :  { %v288_v27 = vadd.f32 %v430_v16, %v194_v23  ;;  %v292_v28 = vadd.f32 %v430_v16, %v204_v24 }
  0xa8   :  { %311 = vst [vmem:[%s553_s3 + $0x40] sm:$0xff] %v295_v25 }
  0xa9   :  { %315 = vst [vmem:[%s553_s3 + $0x60] sm:$0xff] %v299_v26 }
  0xaa   :  { %304 = vst [vmem:[%s553_s3 + $0x8] sm:$0xff] %v288_v27 }
  0xab   :  { %308 = vst [vmem:[%s553_s3 + $0x28] sm:$0xff] %v292_v28 }
  0xad   :  { %v214_v29 = vpop.f32.mrf.mxu2  ;;  %v224_v30 = vpop.f32.mrf.mxu3 }
  0xae   :  { %v197_v31 = vpop.f32.mrf.mxu0  ;;  %v207_v32 = vpop.f32.mrf.mxu1  ;;  %v296_v33 = vadd.f32 %v430_v16, %v214_v29  ;;  %v300_v34 = vadd.f32 %v430_v16, %v224_v30 }
  0xaf   :  { %v289_v35 = vadd.f32 %v430_v16, %v197_v31  ;;  %v293_v36 = vadd.f32 %v430_v16, %v207_v32 }
  0xb0   :  { %312 = vst [vmem:[%s553_s3 + $0x48] sm:$0xff] %v296_v33 }
  0xb1   :  { %316 = vst [vmem:[%s553_s3 + $0x68] sm:$0xff] %v300_v34 }
  0xb2   :  { %305 = vst [vmem:[%s553_s3 + $0x10] sm:$0xff] %v289_v35 }
  0xb3   :  { %309 = vst [vmem:[%s553_s3 + $0x30] sm:$0xff] %v293_v36 }
  0xb5   :  { %v217_v37 = vpop.f32.mrf.mxu2  ;;  %v227_v38 = vpop.f32.mrf.mxu3 }
  0xb6   :  { %v199_v39 = vpop.f32.mrf.mxu0  ;;  %v209_v40 = vpop.f32.mrf.mxu1  ;;  %v297_v41 = vadd.f32 %v430_v16, %v217_v37  ;;  %v301_v42 = vadd.f32 %v430_v16, %v227_v38 }
  0xb7   :  { %v290_v43 = vadd.f32 %v430_v16, %v199_v39  ;;  %v294_v44 = vadd.f32 %v430_v16, %v209_v40 }
  0xb8   :  { %313 = vst [vmem:[%s553_s3 + $0x50] sm:$0xff] %v297_v41 }
  0xb9   :  { %317 = vst [vmem:[%s553_s3 + $0x70] sm:$0xff] %v301_v42 }
  0xba   :  { %306 = vst [vmem:[%s553_s3 + $0x18] sm:$0xff] %v290_v43 }
  0xbb   :  { %310 = vst [vmem:[%s553_s3 + $0x38] sm:$0xff] %v294_v44 }
  0xbd   :  { %v219_v45 = vpop.f32.mrf.mxu2  ;;  %v229_v46 = vpop.f32.mrf.mxu3 }
  0xbe   :  { %v298_v47 = vadd.f32 %v430_v16, %v219_v45  ;;  %v302_v48 = vadd.f32 %v430_v16, %v229_v46 }
  0xc0   :  { %314 = vst [vmem:[%s553_s3 + $0x58] sm:$0xff] %v298_v47 }
  0xc1   :  { %318 = vst [vmem:[%s553_s3 + $0x78] sm:$0xff] %v302_v48 }

</bundles_post_ra>
